<compile_context>
chip_gen: v5e
topology: v5e:2x2
jax: 0.10.0
libtpu: 0.0.40
codegen_flags: <defaults>
</compile_context>

<pallas_src>
import math

import jax
import jax.numpy as jnp
from jax.experimental import pallas as pl
from jax.experimental.pallas import tpu as pltpu


def _sigmoid_density_kernel(neg_beta_ref, sdf_ref, out_ref):
    # neg_beta_ref: (1,) scalar in SMEM; sdf_ref/out_ref: (bm, L) tiles in VMEM.
    nb = neg_beta_ref[0]                       # already -(|beta| + beta_min)
    out_ref[...] = jax.nn.sigmoid(sdf_ref[...] * nb)


def _round_up(x: int, m: int) -> int:
    return ((x + m - 1) // m) * m


def sigmoid_density(sdf: jax.Array,
                    beta_param: jax.Array,
                    beta_min: float = 1e-4,
                    *,
                    lane_width: int = 1024,
                    block_rows: int = 512) -> jax.Array:
    """Pallas implementation of SigmoidDensity.forward(sdf) with the learnable beta.

    Accepts sdf of arbitrary rank / size; returns an array of the same shape/dtype.
    """
    orig_shape = sdf.shape
    dtype = sdf.dtype

    # Parameter glue (matches module.get_beta()), negation folded into the scalar.
    neg_beta = -(jnp.abs(beta_param) + jnp.asarray(beta_min, dtype)).astype(dtype)
    neg_beta = neg_beta.reshape((1,))

    # Flatten to a lane-dense 2D slab: (rows, L), L a multiple of 128.
    flat = sdf.reshape(-1)
    n = flat.size
    L = lane_width
    assert L % 128 == 0

    rows_needed = max(1, -(-n // L))
    bm = min(block_rows, _round_up(rows_needed, 8))   # single-step path for tiny inputs
    rows = _round_up(rows_needed, bm)

    pad = rows * L - n
    if pad:
        flat = jnp.pad(flat, (0, pad))
    x2d = flat.reshape(rows, L)

    out2d = pl.pallas_call(
        _sigmoid_density_kernel,
        out_shape=jax.ShapeDtypeStruct((rows, L), dtype),
        grid_spec=pltpu.PrefetchScalarGridSpec(
            num_scalar_prefetch=0,
            grid=(rows // bm,),
            in_specs=[
                pl.BlockSpec(memory_space=pltpu.MemorySpace.SMEM),   # neg_beta scalar
                pl.BlockSpec((bm, L), lambda i: (i, 0)),             # sdf tile
            ],
            out_specs=pl.BlockSpec((bm, L), lambda i: (i, 0)),
        ),
        compiler_params=pltpu.CompilerParams(
            dimension_semantics=("parallel",),       # lets v7x shard rows over both TCs
            vmem_limit_bytes=32 * 1024 * 1024,       # headroom on v5e's smaller default
        ),
    )(neg_beta, x2d)

    out = out2d.reshape(-1)
    if pad:
        out = out[:n]
    return out.reshape(orig_shape)


if __name__ == "__main__":
    key = jax.random.PRNGKey(0)

    # Module init: init_val * torch.ones(1) -> deterministic scalar parameter.
    init_val = 0.1
    beta_min = 1e-4
    beta_param = init_val * jnp.ones((1,), dtype=jnp.float32)

    # Realistic nerfstudio-style SDF input: (num_rays, num_samples, 1),
    # deliberately NOT a multiple of (8, 128) to exercise the pad/flatten path.
    sdf = jax.random.normal(key, (4, 48, 1), dtype=jnp.float32)

    out = sigmoid_density(sdf, beta_param, beta_min)
    out = jax.block_until_ready(out)

    # Reference check in plain JAX.
    beta_ref = jnp.abs(beta_param) + beta_min
    ref = jax.nn.sigmoid(-sdf * beta_ref[0])
    assert out.shape == sdf.shape and out.dtype == sdf.dtype
    assert jnp.allclose(out, ref, atol=1e-6, rtol=1e-6)

    # Also check a larger multi-tile case to exercise the grid path.
    sdf_big = jax.random.normal(jax.random.PRNGKey(1), (700, 1234), dtype=jnp.float32)
    out_big = jax.block_until_ready(sigmoid_density(sdf_big, beta_param, beta_min))
    ref_big = jax.nn.sigmoid(-sdf_big * beta_ref[0])
    assert jnp.allclose(out_big, ref_big, atol=1e-6, rtol=1e-6)

    print("KERNEL_OK")
</pallas_src>

<mosaic_0001>
module attributes {stable_mosaic.version = 11 : i64} {
  func.func @_sigmoid_density_kernel(%arg0: i32, %arg1: memref<1xf32, #tpu.memory_space<smem>>, %arg2: memref<8x1024xf32, #tpu.memory_space<vmem>>, %arg3: memref<8x1024xf32, #tpu.memory_space<vmem>>) attributes {dimension_semantics = [#tpu.dimension_semantics<parallel>], iteration_bounds = array<i64: 1>, scalar_prefetch = 0 : i64, scratch_operands = 0 : i64, tpu.core_type = #tpu.core_type<tc>, window_params = [{transform_indices = @transform_0, window_bounds = array<i64: 1>}, {transform_indices = @transform_1, window_bounds = array<i64: 8, 1024>}, {transform_indices = @transform_2, window_bounds = array<i64: 8, 1024>}]} {
    %c0 = arith.constant 0 : index
    %0 = memref.load %arg1[%c0] : memref<1xf32, #tpu.memory_space<smem>>
    %c0_0 = arith.constant 0 : index
    %c0_1 = arith.constant 0 : index
    %1 = vector.load %arg2[%c0_0, %c0_1] : memref<8x1024xf32, #tpu.memory_space<vmem>>, vector<8x1024xf32>
    %2 = vector.broadcast %0 : f32 to vector<8x1024xf32>
    %3 = arith.mulf %1, %2 : vector<8x1024xf32>
    %4 = arith.negf %3 : vector<8x1024xf32>
    %5 = math.exp %4 : vector<8x1024xf32>
    %cst = arith.constant 1.000000e+00 : f32
    %6 = vector.broadcast %cst : f32 to vector<8x1024xf32>
    %7 = arith.addf %6, %5 : vector<8x1024xf32>
    %8 = arith.divf %6, %7 : vector<8x1024xf32>
    %c0_2 = arith.constant 0 : index
    %c0_3 = arith.constant 0 : index
    %9 = vector.load %arg3[%c0_2, %c0_3] : memref<8x1024xf32, #tpu.memory_space<vmem>>, vector<8x1024xf32>
    tpu.vector_store %arg3[%c0_2, %c0_3], %8 {strides = array<i32>} : memref<8x1024xf32, #tpu.memory_space<vmem>>, vector<8x1024xf32>,
    return
  }
  func.func @transform_0(%arg0: i32) -> i32 {
    %c0_i32 = arith.constant 0 : i32
    %c0_i32_0 = arith.constant 0 : i32
    return %c0_i32 : i32
  }
  func.func @transform_1(%arg0: i32) -> (i32, i32) {
    %c0_i32 = arith.constant 0 : i32
    %c0_i32_0 = arith.constant 0 : i32
    return %arg0, %c0_i32 : i32, i32
  }
  func.func @transform_2(%arg0: i32) -> (i32, i32) {
    %c0_i32 = arith.constant 0 : i32
    %c0_i32_0 = arith.constant 0 : i32
    return %arg0, %c0_i32 : i32, i32
  }
}

</mosaic_0001>

<bundles_post_ra>
// kernel: tpu_custom_call.1
= control target key start
LH: loop header
LB: loop body
LE: loop exit
PB: predicated region body
PF: predicated region fallthrough
CT: control target
= control target key end

     0   :  { %8 = vsyncpa [#allocation4], 0  ;;  %s454_s0 = inlined_call_operand.<no memory space> [shape: f32[1], index: 0, kind: input, shape index: {}]   ;;  %s455_s1 = inlined_call_operand.hbm [shape: f32[8,1024], index: 1, kind: input, shape index: {}]   ;;  %s456_s2 = inlined_call_operand.hbm [shape: f32[8,1024], index: 2, kind: output, shape index: {}]  }
   0x1   :  { %9 = vsyncpa [#allocation5], 0  ;;  %s17_s11 = sshll.u32 %s455_s1, 4  ;;  %s316_s12 = smov [#allocation3]   ;;  %s18_s11 = int_to_ptr.hbm [resolvable:$true] %s17_s11 }
   0x2   :  { %s19_s13 = sshll.u32 %s316_s12, 4  ;;  %s20_s13 = int_to_ptr.vmem [resolvable:$true] %s19_s13 }
   0x3   :  { %22 = dma.hbm_to_vmem [thread:$0]  %s18_s11, 1024, %s20_s13, [#allocation4]  }
   0x4   :  { %312 = dma.done.wait [#allocation4], 1024  }
   0x5   :  { %313 = vsyncadd [#allocation4], 4294966272  ;;  %v36_v0 = vstv %s454_s0  ;;  %v28_v1 = vld [vmem:[#allocation3] sm:$0xff]  ;;  %v29_v2 = vld [vmem:[#allocation3 + $0x8] sm:$0xff]  ;;  %s317_s0 = smov [#allocation6]   ;;  %s212_s18 = sshll.u32 %s456_s2, 4  ;;  %s213_s18 = int_to_ptr.hbm [resolvable:$true] %s212_s18 }
   0x6   :  { %v30_v3 = vld [vmem:[#allocation3 + $0x10] sm:$0xff]  ;;  %v37_v4 = vmul.f32 %v36_v0, %v28_v1  ;;  %v38_v5 = vmul.f32 %v36_v0, %v29_v2  ;;  %v31_v7 = vld [vmem:[#allocation3 + $0x18] sm:$0xff]  ;;  %v32_v8 = vld [vmem:[#allocation3 + $0x20] sm:$0xff]  ;;  %s210_s1 = sshll.u32 %s317_s0, 4  ;;  %s211_s1 = int_to_ptr.vmem [resolvable:$true] %s210_s1 }
   0x7   :  { %v39_v6 = vmul.f32 %v36_v0, %v30_v3  ;;  %v33_v9 = vld [vmem:[#allocation3 + $0x28] sm:$0xff]  ;;  %v40_v10 = vmul.f32 %v36_v0, %v31_v7  ;;  %v41_v11 = vmul.f32 %v36_v0, %v32_v8  ;;  %v34_v18 = vld [vmem:[#allocation3 + $0x30] sm:$0xff]  ;;  %v35_v20 = vld [vmem:[#allocation3 + $0x38] sm:$0xff] }
   0x8   :  { %v42_v12 = vmul.f32 %v36_v0, %v33_v9  ;;  %v222_v13 = vmul.f32 -1.442695, %v37_v4  ;;  %v223_v14 = vmul.f32 -1.442695, %v38_v5  ;;  %v43_v21 = vmul.f32 %v36_v0, %v34_v18 }
   0x9   :  { %v224_v15 = vmul.f32 -1.442695, %v39_v6  ;;  %v225_v16 = vmul.f32 -1.442695, %v40_v10  ;;  %v226_v17 = vmul.f32 -1.442695, %v41_v11  ;;  %v44_v22 = vmul.f32 %v36_v0, %v35_v20 }
   0xa   :  { %232 = vpow2.f32 %v222_v13  ;;  %v227_v19 = vmul.f32 -1.442695, %v42_v12  ;;  %v228_v26 = vmul.f32 -1.442695, %v43_v21 }
   0xb   :  { %234 = vpow2.f32 %v223_v14  ;;  %v229_v29 = vmul.f32 -1.442695, %v44_v22 }
   0xc   :  { %236 = vpow2.f32 %v224_v15 }
   0xd   :  { %238 = vpow2.f32 %v225_v16 }
   0xe   :  { %240 = vpow2.f32 %v226_v17 }
   0xf   :  { %242 = vpow2.f32 %v227_v19 }
  0x10   :  { %v233_v23 = vpop.eup %232 }
  0x11   :  { %v235_v24 = vpop.eup %234  ;;  %v69_v25 = vadd.f32 1.0, %v233_v23 }
  0x12   :  { %v237_v27 = vpop.eup %236  ;;  %v339_v28 = vadd.f32 1.0, %v235_v24 }
  0x13   :  { %v239_v30 = vpop.eup %238  ;;  %244 = vrcp.f32 %v69_v25  ;;  %v86_v32 = vand.u32 2147483647, %v69_v25  ;;  %v88_v34 = vand.u32 2147483648, %v69_v25  ;;  %v342_v35 = vadd.f32 1.0, %v237_v27 }
  0x14   :  { %v241_v31 = vpop.eup %240  ;;  %246 = vrcp.f32 %v339_v28  ;;  %v344_v36 = vadd.f32 1.0, %v239_v30  ;;  %v101_v37 = vand.u32 2147483647, %v339_v28  ;;  %v103_v38 = vand.u32 2147483648, %v339_v28 }
  0x15   :  { %v243_v33 = vpop.eup %242  ;;  %248 = vpow2.f32 %v228_v26  ;;  %v348_v39 = vadd.f32 1.0, %v241_v31  ;;  %vm82_vm0 = vweird.f32 %v69_v25  ;;  %vm97_vm1 = vweird.f32 %v339_v28 }
  0x16   :  { %250 = vpow2.f32 %v229_v29  ;;  %v118_v40 = vand.u32 2147483648, %v342_v35  ;;  %vm353_vm2 = vcmp.eq.f32.partialorder %v86_v32, 8.507059e+37  ;;  %v116_v42 = vand.u32 2147483647, %v342_v35 }
  0x17   :  { %252 = vrcp.f32 %v342_v35  ;;  %v359_v43 = vadd.f32 1.0, %v243_v33  ;;  %v89_v45 = vor.u32 1.1754944e-38, %v88_v34  ;;  %v131_v46 = vand.u32 2147483647, %v344_v36 }
  0x18   :  { %254 = vrcp.f32 %v344_v36  ;;  %v133_v47 = vand.u32 2147483648, %v344_v36  ;;  %vm364_vm3 = vcmp.eq.f32.partialorder %v101_v37, 8.507059e+37  ;;  %v104_v51 = vor.u32 1.1754944e-38, %v103_v38 }
  0x19   :  { %v245_v44 = vpop.eup %244  ;;  %256 = vrcp.f32 %v348_v39  ;;  %vm112_vm4 = vweird.f32 %v342_v35  ;;  %v119_v54 = vor.u32 1.1754944e-38, %v118_v40  ;;  %vm127_vm5 = vweird.f32 %v344_v36 }
  0x1a   :  { %v247_v48 = vpop.eup %246  ;;  %v78_v49 = vmul.f32 %v245_v44, %v69_v25  ;;  %v148_v55 = vand.u32 2147483648, %v348_v39  ;;  %vm83_vm6 = vweird.f32 %v245_v44  ;;  %vm372_vm7 = vcmp.eq.f32.partialorder %v116_v42, 8.507059e+37 }
  0x1b   :  { %v249_v52 = vpop.eup %248  ;;  %v93_v53 = vmul.f32 %v247_v48, %v339_v28  ;;  %vm142_vm8 = vweird.f32 %v348_v39  ;;  %258 = vrcp.f32 %v359_v43  ;;  %vm98_vm9 = vweird.f32 %v247_v48  ;;  %vm388_vm12 = vmor %vm82_vm0, %vm83_vm6 }
  0x1c   :  { %v251_v56 = vpop.eup %250  ;;  %v79_v57 = vsub.f32 1.0, %v78_v49  ;;  %vm378_vm10 = vcmp.eq.f32.partialorder %v131_v46, 8.507059e+37  ;;  %v134_v62 = vor.u32 1.1754944e-38, %v133_v47  ;;  %v146_v63 = vand.u32 2147483647, %v348_v39  ;;  %vm396_vm14 = vmor %vm97_vm1, %vm98_vm9 }
  0x1d   :  { %v253_v59 = vpop.eup %252  ;;  %v94_v60 = vsub.f32 1.0, %v93_v53  ;;  %vm157_vm11 = vweird.f32 %v359_v43  ;;  %v161_v3 = vand.u32 2147483647, %v359_v43  ;;  %v149_v8 = vor.u32 1.1754944e-38, %v148_v55 }
  0x1e   :  { %v255_v0 = vpop.eup %254  ;;  %v80_v1 = vmul.f32 %v245_v44, %v79_v57  ;;  %v108_v2 = vmul.f32 %v253_v59, %v342_v35  ;;  %vm113_vm13 = vweird.f32 %v253_v59  ;;  %v75_v15 = vadd.f32 1.0, %v249_v52 }
  0x1f   :  { %v257_v4 = vpop.eup %256  ;;  %v95_v6 = vmul.f32 %v247_v48, %v94_v60  ;;  %v123_v7 = vmul.f32 %v255_v0, %v344_v36  ;;  %vm128_vm15 = vweird.f32 %v255_v0  ;;  %v403_v20 = vadd.f32 1.0, %v251_v56  ;;  %vm412_vm1 = vmor %vm112_vm4, %vm113_vm13 }
  0x20   :  { %v81_v9 = vadd.f32 %v245_v44, %v80_v1  ;;  %v109_v11 = vsub.f32 1.0, %v108_v2  ;;  %v138_v12 = vmul.f32 %v257_v4, %v348_v39  ;;  %vm143_vm0 = vweird.f32 %v257_v4 }
  0x21   :  { %v96_v13 = vadd.f32 %v247_v48, %v95_v6  ;;  %v124_v14 = vsub.f32 1.0, %v123_v7  ;;  %v259_v16 = vpop.eup %258  ;;  %v163_v30 = vand.u32 2147483648, %v359_v43  ;;  %vm430_vm4 = vmor %vm142_vm8, %vm143_vm0  ;;  %260 = vrcp.f32 %v75_v15 }
  0x22   :  { %v85_v17 = vsel %vm388_vm12, %v245_v44, %v81_v9  ;;  %v110_v18 = vmul.f32 %v253_v59, %v109_v11  ;;  %v139_v19 = vsub.f32 1.0, %v138_v12  ;;  %v153_v25 = vmul.f32 %v259_v16, %v359_v43 }
  0x23   :  { %v90_v21 = vsel %vm353_vm2, %v89_v45, %v85_v17  ;;  %v100_v22 = vsel %vm396_vm14, %v247_v48, %v96_v13  ;;  %v125_v24 = vmul.f32 %v255_v0, %v124_v14  ;;  %vm422_vm2 = vmor %vm127_vm5, %vm128_vm15  ;;  %vm147_vm5 = vcmp.eq.f32.partialorder %v146_v63, 8.507059e+37 }
  0x24   :  { %197 = vst [vmem:[#allocation6] sm:$0xff] %v90_v21  ;;  %v105_v26 = vsel %vm364_vm3, %v104_v51, %v100_v22  ;;  %v111_v27 = vadd.f32 %v253_v59, %v110_v18  ;;  %v140_v29 = vmul.f32 %v257_v4, %v139_v19  ;;  %v154_v33 = vsub.f32 1.0, %v153_v25 }
  0x25   :  { %198 = vst [vmem:[#allocation6 + $0x8] sm:$0xff] %v105_v26  ;;  %v126_v31 = vadd.f32 %v255_v0, %v125_v24  ;;  %vm158_vm3 = vweird.f32 %v259_v16  ;;  %262 = vrcp.f32 %v403_v20  ;;  %v164_v41 = vor.u32 1.1754944e-38, %v163_v30 }
  0x26   :  { %v115_v34 = vsel %vm412_vm1, %v253_v59, %v111_v27  ;;  %v141_v35 = vadd.f32 %v257_v4, %v140_v29  ;;  %v155_v38 = vmul.f32 %v259_v16, %v154_v33  ;;  %vm159_vm6 = vmor %vm157_vm11, %vm158_vm3  ;;  %vm172_vm8 = vweird.f32 %v75_v15 }
  0x27   :  { %v120_v36 = vsel %vm372_vm7, %v119_v54, %v115_v34  ;;  %v130_v37 = vsel %vm422_vm2, %v255_v0, %v126_v31  ;;  %vm162_vm7 = vcmp.eq.f32.partialorder %v161_v3, 8.507059e+37  ;;  %v261_v45 = vpop.eup %260  ;;  %v178_v50 = vand.u32 2147483648, %v75_v15 }
  0x28   :  { %199 = vst [vmem:[#allocation6 + $0x10] sm:$0xff] %v120_v36  ;;  %v135_v39 = vsel %vm378_vm10, %v134_v62, %v130_v37  ;;  %v145_v40 = vsel %vm430_vm4, %v257_v4, %v141_v35  ;;  %v156_v44 = vadd.f32 %v259_v16, %v155_v38  ;;  %v168_v48 = vmul.f32 %v261_v45, %v75_v15 }
  0x29   :  { %200 = vst [vmem:[#allocation6 + $0x18] sm:$0xff] %v135_v39  ;;  %v150_v42 = vsel %vm147_vm5, %v149_v8, %v145_v40  ;;  %vm173_vm9 = vweird.f32 %v261_v45  ;;  %v176_v52 = vand.u32 2147483647, %v75_v15  ;;  %vm187_vm10 = vweird.f32 %v403_v20 }
  0x2a   :  { %201 = vst [vmem:[#allocation6 + $0x20] sm:$0xff] %v150_v42  ;;  %v160_v46 = vsel %vm159_vm6, %v259_v16, %v156_v44  ;;  %v169_v51 = vsub.f32 1.0, %v168_v48  ;;  %v193_v53 = vand.u32 2147483648, %v403_v20  ;;  %v191_v56 = vand.u32 2147483647, %v403_v20  ;;  %vm174_vm12 = vmor %vm172_vm8, %vm173_vm9 }
  0x2b   :  { %v165_v47 = vsel %vm162_vm7, %v164_v41, %v160_v46  ;;  %v263_v49 = vpop.eup %262  ;;  %v179_v57 = vor.u32 1.1754944e-38, %v178_v50  ;;  %vm177_vm13 = vcmp.eq.f32.partialorder %v176_v52, 8.507059e+37 }
  0x2c   :  { %202 = vst [vmem:[#allocation6 + $0x28] sm:$0xff] %v165_v47  ;;  %v183_v43 = vmul.f32 %v263_v49, %v403_v20  ;;  %v170_v54 = vmul.f32 %v261_v45, %v169_v51  ;;  %vm188_vm11 = vweird.f32 %v263_v49  ;;  %v194_v60 = vor.u32 1.1754944e-38, %v193_v53 }
  0x2d   :  { %vm189_vm14 = vmor %vm187_vm10, %vm188_vm11  ;;  %vm192_vm15 = vcmp.eq.f32.partialorder %v191_v56, 8.507059e+37 }
  0x2e   :  { %v184_v55 = vsub.f32 1.0, %v183_v43  ;;  %v171_v58 = vadd.f32 %v261_v45, %v170_v54 }
  0x30   :  { %v185_v59 = vmul.f32 %v263_v49, %v184_v55  ;;  %v175_v61 = vsel %vm174_vm12, %v261_v45, %v171_v58 }
  0x31   :  { %v180_v63 = vsel %vm177_vm13, %v179_v57, %v175_v61 }
  0x32   :  { %v186_v62 = vadd.f32 %v263_v49, %v185_v59  ;;  %203 = vst [vmem:[#allocation6 + $0x30] sm:$0xff] %v180_v63 }
  0x34   :  { %v190_v0 = vsel %vm189_vm14, %v263_v49, %v186_v62 }
  0x35   :  { %v195_v1 = vsel %vm192_vm15, %v194_v60, %v190_v0 }
  0x36   :  { %204 = vst [vmem:[#allocation6 + $0x38] sm:$0xff] %v195_v1 }
  0x37   :  { %215 = dma.vmem_to_hbm [thread:$0]  %s211_s1, 1024, %s213_s18, [#allocation5]  }
  0x38   :  { %314 = dma.done.wait [#allocation5], 1024  }
  0x39   :  { %315 = vsyncadd [#allocation5], 4294966272 }
  0x3a   :  { %220 = vsyncpa [#allocation4], 1 }
  0x3b   :  { %221 = vsyncpa [#allocation5], 1 }

</bundles_post_ra>
